<compile_context>
chip_gen: v5e
topology: v5e:2x2
jax: 0.10.0
libtpu: 0.0.40
codegen_flags: <defaults>
</compile_context>

<pallas_src>
import functools
import math

import jax
import jax.numpy as jnp
from jax.experimental import pallas as pl
from jax.experimental.pallas import tpu as pltpu

_MIB = 1024 * 1024
# Finite mask value: scores stay f32 inside the kernel, so -1e30 is safe.
# (Do NOT move the score matrix to bf16 with this constant.)
_NEG_MASK = -1e30


# --------------------------------------------------------------------------
# Per-generation configuration (review: big tiles on v5e/v6e, conservative
# VMEM budget on v7x whose physical VMEM is 64 MiB).
# --------------------------------------------------------------------------
def _device_kind():
    try:
        return jax.devices()[0].device_kind.lower()
    except Exception:
        return ""


def _config():
    kind = _device_kind()
    if "v5" in kind or "v6" in kind:          # 128 MiB physical VMEM
        return dict(vmem_limit=96 * _MIB, lin_tm=512, lin_tn=512, lin_tk=1024,
                    attn_tile=512, rope_tile=256)
    # v7x (64 MiB physical) / unknown: leave double-buffering headroom.
    return dict(vmem_limit=48 * _MIB, lin_tm=256, lin_tn=512, lin_tk=1024,
                attn_tile=512, rope_tile=256)


# --------------------------------------------------------------------------
# Tile helpers.  Block last dims must be multiples of 128 (or the full dim);
# second-to-last dims multiples of 8 (or the full dim).
# --------------------------------------------------------------------------
def _tile_last(dim, target):
    if dim <= target:
        return dim
    t = (min(target, dim) // 128) * 128
    while t >= 128:
        if dim % t == 0:
            return t
        t -= 128
    return dim


def _tile_major(dim, target):
    if dim <= target:
        return dim
    t = (min(target, dim) // 8) * 8
    while t >= 8:
        if dim % t == 0:
            return t
        t -= 8
    return dim


def _pick_heads_per_group(H, Dh):
    """Smallest head-group G dividing H with G*Dh a multiple of 128 so the
    attention output block is lane-dense (e.g. G=8 for Dh=80 -> 640 lanes)."""
    for g in range(1, H + 1):
        if H % g == 0 and (g * Dh) % 128 == 0:
            return g
    return H  # fallback: block covers the full H*Dh axis (always legal)


# --------------------------------------------------------------------------
# Tiled linear projection:  y = x @ w + b     (bias added once, in finalize)
# --------------------------------------------------------------------------
def _linear_kernel(x_ref, w_ref, b_ref, o_ref, acc_ref, *, mxu_dtype):
    k = pl.program_id(2)

    @pl.when(k == 0)
    def _init():
        acc_ref[...] = jnp.zeros_like(acc_ref)

    mm = x_ref.dtype if mxu_dtype is None else mxu_dtype
    acc_ref[...] += jnp.dot(x_ref[...].astype(mm), w_ref[...].astype(mm),
                            preferred_element_type=jnp.float32)

    @pl.when(k == pl.num_programs(2) - 1)
    def _finalize():
        o_ref[...] = (acc_ref[...] + b_ref[...].astype(jnp.float32)).astype(o_ref.dtype)


def linear(x, w, b, *, mxu_dtype, tm, tn, tk, vmem_limit):
    M, K = x.shape
    K2, N = w.shape
    assert K == K2 and b.shape == (N,)
    tm = _tile_major(M, tm)
    tn = _tile_last(N, tn)
    tk = _tile_last(K, tk)
    grid = (M // tm, N // tn, K // tk)
    cost = pl.CostEstimate(
        flops=2 * M * N * K, transcendentals=0,
        bytes_accessed=int((M * K + K * N + M * N + N) * x.dtype.itemsize))
    return pl.pallas_call(
        functools.partial(_linear_kernel, mxu_dtype=mxu_dtype),
        out_shape=jax.ShapeDtypeStruct((M, N), x.dtype),
        grid_spec=pltpu.PrefetchScalarGridSpec(
            num_scalar_prefetch=0,
            grid=grid,
            in_specs=[pl.BlockSpec((tm, tk), lambda i, j, k: (i, k)),
                      pl.BlockSpec((tk, tn), lambda i, j, k: (k, j)),
                      pl.BlockSpec((1, tn), lambda i, j, k: (0, j))],
            out_specs=pl.BlockSpec((tm, tn), lambda i, j, k: (i, j)),
            scratch_shapes=[pltpu.VMEM((tm, tn), jnp.float32)]),
        compiler_params=pltpu.CompilerParams(
            dimension_semantics=("parallel", "parallel", "arbitrary"),
            vmem_limit_bytes=vmem_limit),
        cost_estimate=cost,
    )(x, w, b.reshape(1, N))


# --------------------------------------------------------------------------
# Fused RoPE + head split.
#   qkv (T, 3P) with reference column order (head, [q|k|v], d)  ->
#   q, k, v each (H, T, Dh); rope applied once per token (sm_scale folded into
#   the Q tables), so the flash kernel's inner KV loop does no rope work and
#   no wrapper-side full-HBM QKV transpose is needed.
# --------------------------------------------------------------------------
def _rope_split_kernel(qkv_ref, tab_ref, qo_ref, ko_ref, vo_ref, *, H, Dh):
    half = Dh // 2
    cq = tab_ref[0]       # (tile, half) f32: cos * sm_scale
    sq = tab_ref[1]       # sin * sm_scale
    ck = tab_ref[2]       # cos
    sk = tab_ref[3]       # sin
    # Static unroll over heads; this pass runs once per token (NOT in the
    # attention hot loop), so the sub-128-lane slices/concats are acceptable.
    for h in range(H):
        base = 3 * Dh * h
        q = qkv_ref[:, base:base + Dh].astype(jnp.float32)
        k = qkv_ref[:, base + Dh:base + 2 * Dh].astype(jnp.float32)
        q1, q2 = q[:, :half], q[:, half:]
        k1, k2 = k[:, :half], k[:, half:]
        # sign-folded half-table rope: out = [x1*c - x2*s, x2*c + x1*s]
        qo_ref[h] = jnp.concatenate([q1 * cq - q2 * sq, q2 * cq + q1 * sq],
                                    axis=-1).astype(qo_ref.dtype)
        ko_ref[h] = jnp.concatenate([k1 * ck - k2 * sk, k2 * ck + k1 * sk],
                                    axis=-1).astype(ko_ref.dtype)
        vo_ref[h] = qkv_ref[:, base + 2 * Dh:base + 3 * Dh]


def _rope_split(qkv, tab, H, Dh, tile_r, vmem_limit):
    T, threeP = qkv.shape
    assert threeP == 3 * H * Dh
    tile_r = _tile_major(T, tile_r)
    n = T // tile_r
    half = Dh // 2
    out_sd = jax.ShapeDtypeStruct((H, T, Dh), qkv.dtype)
    cost = pl.CostEstimate(
        flops=8 * H * T * Dh, transcendentals=0,
        bytes_accessed=int(2 * T * threeP * qkv.dtype.itemsize))
    out_spec = pl.BlockSpec((H, tile_r, Dh), lambda i: (0, i, 0))
    return pl.pallas_call(
        functools.partial(_rope_split_kernel, H=H, Dh=Dh),
        out_shape=(out_sd, out_sd, out_sd),
        grid_spec=pltpu.PrefetchScalarGridSpec(
            num_scalar_prefetch=0,
            grid=(n,),
            in_specs=[pl.BlockSpec((tile_r, threeP), lambda i: (i, 0)),
                      pl.BlockSpec((4, tile_r, half), lambda i: (0, i, 0))],
            out_specs=(out_spec, out_spec, out_spec)),
        compiler_params=pltpu.CompilerParams(
            dimension_semantics=("parallel",),
            vmem_limit_bytes=vmem_limit),
        cost_estimate=cost,
    )(qkv, tab)


# --------------------------------------------------------------------------
# Flash-style varlen attention (online softmax).
#   grid = (head_groups, q_tiles, kv_tiles), kv innermost / 'arbitrary'.
#   Q/K are already roped (and Q pre-scaled).  K/V index maps clamp the kv
#   tile index into the q-tile's segment range so off-segment tiles are
#   neither computed (pl.when) nor re-DMA'd (unchanged block index).
#   Output is written lane-dense as (tile_t, G*Dh) blocks of a (T, H*Dh) ctx.
# --------------------------------------------------------------------------
def _flash_attn_kernel(lo_ref, hi_ref,                     # scalar prefetch (SMEM)
                       segq_ref, segk_ref,                 # (1, tile_t) int32
                       q_ref, k_ref, v_ref,                # (G, tile_t, Dh)
                       o_ref,                              # (tile_t, G*Dh)
                       m_sc, l_sc, acc_sc,                 # VMEM scratch
                       *, mxu_dtype, approx_recip, G):
    qi = pl.program_id(1)
    ki = pl.program_id(2)
    mm = q_ref.dtype if mxu_dtype is None else mxu_dtype

    @pl.when(ki == 0)
    def _init():
        m_sc[...] = jnp.full(m_sc.shape, -jnp.inf, jnp.float32)
        l_sc[...] = jnp.zeros_like(l_sc)
        acc_sc[...] = jnp.zeros_like(acc_sc)

    in_range = jnp.logical_and(ki >= lo_ref[qi], ki <= hi_ref[qi])

    @pl.when(in_range)
    def _compute():
        s = jnp.einsum("gqd,gkd->gqk",
                       q_ref[...].astype(mm), k_ref[...].astype(mm),
                       preferred_element_type=jnp.float32)       # (G, tq, tk) f32
        mask = jnp.transpose(segq_ref[...]) == segk_ref[...]     # (tq, tk)
        s = jnp.where(mask[None], s, _NEG_MASK)                  # finite, f32-safe

        m_prev = m_sc[...]
        m_new = jnp.maximum(m_prev, s.max(axis=-1, keepdims=True))
        alpha = jnp.exp(m_prev - m_new)
        p = jnp.exp(s - m_new)                                   # f32 softmax math
        l_sc[...] = alpha * l_sc[...] + p.sum(axis=-1, keepdims=True)
        pv = jnp.einsum("gqk,gkd->gqd",
                        p.astype(mm), v_ref[...].astype(mm),
                        preferred_element_type=jnp.float32)
        acc_sc[...] = alpha * acc_sc[...] + pv
        m_sc[...] = m_new

    @pl.when(ki == pl.num_programs(2) - 1)
    def _finalize():
        if approx_recip:
            inv_l = pl.reciprocal(l_sc[...], approx=True)        # EUP slot
        else:
            inv_l = 1.0 / l_sc[...]                              # exact parity
        ctx = acc_sc[...] * inv_l                                # (G, tq, Dh) f32
        # (G, tq, Dh) -> (tq, G*Dh) relayout done ONCE per q-tile -> lane-dense store
        o_ref[...] = jnp.concatenate([ctx[h] for h in range(G)],
                                     axis=-1).astype(o_ref.dtype)


def _flash_attention(q, k, v, seg2d, kv_lo, kv_hi, *, tile_t, G, mxu_dtype,
                     approx_recip, vmem_limit):
    H, T, Dh = q.shape
    n_t = T // tile_t
    n_g = H // G
    P = H * Dh

    def clamp(ki, qi, lo, hi):
        return jnp.minimum(jnp.maximum(ki, lo[qi]), hi[qi])

    segq_map = lambda g, qi, ki, lo, hi: (0, qi)
    segk_map = lambda g, qi, ki, lo, hi: (0, clamp(ki, qi, lo, hi))
    q_map = lambda g, qi, ki, lo, hi: (g, qi, 0)
    kv_map = lambda g, qi, ki, lo, hi: (g, clamp(ki, qi, lo, hi), 0)
    out_map = lambda g, qi, ki, lo, hi: (qi, g)

    cost = pl.CostEstimate(
        flops=4 * H * T * T * Dh,
        transcendentals=H * T * T,
        # advisory, no-skip upper bound: q + ctx once, K/V re-read per q tile
        bytes_accessed=int((H * T * Dh * (2 + 2 * n_t) + T * P) * q.dtype.itemsize))

    return pl.pallas_call(
        functools.partial(_flash_attn_kernel, mxu_dtype=mxu_dtype,
                          approx_recip=approx_recip, G=G),
        out_shape=jax.ShapeDtypeStruct((T, P), q.dtype),
        grid_spec=pltpu.PrefetchScalarGridSpec(
            num_scalar_prefetch=2,                       # kv_lo, kv_hi -> SMEM
            grid=(n_g, n_t, n_t),
            in_specs=[pl.BlockSpec((1, tile_t), segq_map),
                      pl.BlockSpec((1, tile_t), segk_map),
                      pl.BlockSpec((G, tile_t, Dh), q_map),
                      pl.BlockSpec((G, tile_t, Dh), kv_map),
                      pl.BlockSpec((G, tile_t, Dh), kv_map)],
            out_specs=pl.BlockSpec((tile_t, G * Dh), out_map),
            scratch_shapes=[pltpu.VMEM((G, tile_t, 1), jnp.float32),   # m
                            pltpu.VMEM((G, tile_t, 1), jnp.float32),   # l
                            pltpu.VMEM((G, tile_t, Dh), jnp.float32)]),  # acc
        compiler_params=pltpu.CompilerParams(
            # head-group and q-tile axes parallel (megacore / v7x 2-TC),
            # kv reduction axis arbitrary.  (For v7x keep n_g even: H=16,G=8 -> 2.)
            dimension_semantics=("parallel", "parallel", "arbitrary"),
            vmem_limit_bytes=vmem_limit),
        cost_estimate=cost,
    )(kv_lo, kv_hi, seg2d, seg2d, q, k, v)


# --------------------------------------------------------------------------
# Forward pass (mirrors Qwen2VisionAttention.forward, world_size == 1)
# --------------------------------------------------------------------------
def qwen2_vision_attention(x, cu_seqlens, rotary_pos_emb, params, num_heads,
                           head_dim, *, mxu_dtype=jnp.bfloat16,
                           approx_recip=True, config=None):
    S, B, E = x.shape
    H, Dh = num_heads, head_dim
    P = H * Dh
    T = B * S
    assert rotary_pos_emb.shape == (S, Dh // 2)
    cfg = dict(_config()) if config is None else dict(config)

    # ---- tokens to (b s) order so cu_seqlens indexes rows directly ----
    x_bs = jnp.transpose(x, (1, 0, 2)).reshape(T, E)

    # ---- QKV projection (tiled Pallas matmul, bf16 MXU / f32 accum) ----
    qkv = linear(x_bs, params["w_qkv"], params["b_qkv"], mxu_dtype=mxu_dtype,
                 tm=cfg["lin_tm"], tn=cfg["lin_tn"], tk=cfg["lin_tk"],
                 vmem_limit=cfg["vmem_limit"])                    # (T, 3P)

    # ---- fused RoPE + head split (rope applied once; sm_scale folded into Q) ----
    sm_scale = 1.0 / math.sqrt(Dh)
    freqs = jnp.tile(rotary_pos_emb.astype(jnp.float32), (B, 1))  # (T, Dh//2)
    c, s = jnp.cos(freqs), jnp.sin(freqs)
    tab = jnp.stack([c * sm_scale, s * sm_scale, c, s], axis=0)   # (4, T, Dh//2)
    q, k, v = _rope_split(qkv, tab, H, Dh, cfg["rope_tile"],
                          cfg["vmem_limit"])                      # each (H, T, Dh)

    # ---- segment ids + per-q-tile kv-tile ranges (compute + DMA skipping) ----
    # NOTE: tokens at/after cu_seqlens[-1] (padding) get segment id N_seq and
    # only attend among themselves — their rows are meaningless downstream.
    tile_t = _tile_last(T, cfg["attn_tile"])
    n_t = T // tile_t
    tok = jnp.arange(T, dtype=jnp.int32)
    cs = cu_seqlens.astype(jnp.int32)
    seg = (jnp.searchsorted(cs, tok, side="right") - 1).astype(jnp.int32)
    seg2d = seg.reshape(1, T)
    tmin = seg.reshape(n_t, tile_t).min(axis=1)
    tmax = seg.reshape(n_t, tile_t).max(axis=1)
    # segment ids are monotone over tokens, so each q-tile's overlapping kv
    # tiles form the contiguous range [kv_lo, kv_hi] (always contains qi).
    kv_lo = jnp.searchsorted(tmax, tmin, side="left").astype(jnp.int32)
    kv_hi = (jnp.searchsorted(tmin, tmax, side="right") - 1).astype(jnp.int32)

    G = _pick_heads_per_group(H, Dh)                              # lane-dense G*Dh

    ctx = _flash_attention(q, k, v, seg2d, kv_lo, kv_hi, tile_t=tile_t, G=G,
                           mxu_dtype=mxu_dtype, approx_recip=approx_recip,
                           vmem_limit=cfg["vmem_limit"])          # (T, H*Dh)

    # ---- output projection ----
    y = linear(ctx, params["w_proj"], params["b_proj"], mxu_dtype=mxu_dtype,
               tm=cfg["lin_tm"], tn=cfg["lin_tn"], tk=cfg["lin_tk"],
               vmem_limit=cfg["vmem_limit"])                      # (T, E)
    return jnp.transpose(y.reshape(B, S, E), (1, 0, 2))           # (S, B, E)


# --------------------------------------------------------------------------
# Pure-JAX reference (for correctness check)
# --------------------------------------------------------------------------
def reference_forward(x, cu_seqlens, rotary_pos_emb, params, num_heads, head_dim):
    with jax.default_matmul_precision("float32"):
        S, B, E = x.shape
        H, Dh = num_heads, head_dim
        T = S * B
        qkv = x.reshape(S * B, E) @ params["w_qkv"] + params["b_qkv"]
        qkv = qkv.reshape(S, B, H, 3 * Dh)
        q, k, v = jnp.split(qkv, 3, axis=-1)
        q, k, v = [jnp.transpose(t, (1, 0, 2, 3)).reshape(T, H, Dh) for t in (q, k, v)]
        cos = jnp.cos(rotary_pos_emb)
        sin = jnp.sin(rotary_pos_emb)
        cos = jnp.tile(jnp.concatenate([cos, cos], -1), (B, 1))[:, None, :]
        sin = jnp.tile(jnp.concatenate([sin, sin], -1), (B, 1))[:, None, :]

        def rope(t):
            t1, t2 = jnp.split(t, 2, axis=-1)
            return t * cos + jnp.concatenate([-t2, t1], -1) * sin

        q, k = rope(q), rope(k)
        seg = jnp.searchsorted(cu_seqlens, jnp.arange(T), side="right") - 1
        mask = seg[:, None] == seg[None, :]
        s = jnp.einsum("thd,shd->hts", q, k) / (Dh ** 0.5)
        s = jnp.where(mask[None], s, -1e30)
        p = jax.nn.softmax(s, axis=-1)
        o = jnp.einsum("hts,shd->thd", p, v)                      # (T, H, Dh)
        ctx = o.reshape(B, S, H, Dh)
        ctx = jnp.transpose(ctx, (1, 0, 2, 3)).reshape(S * B, H * Dh)
        y = ctx @ params["w_proj"] + params["b_proj"]
        return y.reshape(S, B, E)


# --------------------------------------------------------------------------
if __name__ == "__main__":
    embed_dim = 32
    num_heads = 2
    projection_size = 32
    head_dim = projection_size // num_heads      # 16
    S, B = 8, 2                                  # seq, batch

    key = jax.random.PRNGKey(0)
    k1, k2, k3, k4, k5, k6 = jax.random.split(key, 6)
    params = {
        "w_qkv": 0.02 * jax.random.normal(k1, (embed_dim, 3 * projection_size), jnp.float32),
        "b_qkv": 0.02 * jax.random.normal(k2, (3 * projection_size,), jnp.float32),
        "w_proj": 0.02 * jax.random.normal(k3, (projection_size, embed_dim), jnp.float32),
        "b_proj": 0.02 * jax.random.normal(k4, (embed_dim,), jnp.float32),
    }
    x = jax.random.normal(k5, (S, B, embed_dim), jnp.float32)
    rotary_pos_emb = jax.random.normal(k6, (S, head_dim // 2), jnp.float32)
    # two variable-length sequences over the flattened (b*s)=16 token axis
    cu_seqlens = jnp.array([0, S, 2 * S], dtype=jnp.int32)

    ref = reference_forward(x, cu_seqlens, rotary_pos_emb, params, num_heads, head_dim)

    # strict f32 path (f32 MXU operands, exact softmax reciprocal)
    out = qwen2_vision_attention(x, cu_seqlens, rotary_pos_emb, params,
                                 num_heads, head_dim,
                                 mxu_dtype=jnp.float32, approx_recip=False)
    out = jax.block_until_ready(out)
    assert out.shape == (S, B, embed_dim)
    assert jnp.allclose(out, ref, atol=5e-4, rtol=5e-4), "f32 mismatch vs JAX reference"

    # default fast path: bf16 MXU operands, f32 accumulation/softmax, approx recip
    out_fast = qwen2_vision_attention(x, cu_seqlens, rotary_pos_emb, params,
                                      num_heads, head_dim)
    out_fast = jax.block_until_ready(out_fast)
    assert jnp.allclose(out_fast, ref, atol=1e-2, rtol=1e-1), \
        "bf16-MXU mismatch vs JAX reference"

    print("KERNEL_OK")
</pallas_src>

<mosaic_0001>
module attributes {stable_mosaic.version = 11 : i64} {
  func.func @_linear_kernel(%arg0: i32, %arg1: i32, %arg2: i32, %arg3: memref<16x32xf32, #tpu.memory_space<vmem>>, %arg4: memref<32x96xf32, #tpu.memory_space<vmem>>, %arg5: memref<1x96xf32, #tpu.memory_space<vmem>>, %arg6: memref<16x96xf32, #tpu.memory_space<vmem>>, %arg7: memref<16x96xf32, #tpu.memory_space<vmem>>) attributes {dimension_semantics = [#tpu.dimension_semantics<parallel>, #tpu.dimension_semantics<parallel>, #tpu.dimension_semantics<arbitrary>], iteration_bounds = array<i64: 1, 1, 1>, scalar_prefetch = 0 : i64, scratch_operands = 1 : i64, tpu.core_type = #tpu.core_type<tc>, window_params = [{transform_indices = @transform_0, window_bounds = array<i64: 16, 32>}, {transform_indices = @transform_1, window_bounds = array<i64: 32, 96>}, {transform_indices = @transform_2, window_bounds = array<i64: 1, 96>}, {transform_indices = @transform_3, window_bounds = array<i64: 16, 96>}]} {
    %c0_i32 = arith.constant 0 : i32
    %0 = arith.cmpi eq, %arg2, %c0_i32 : i32
    %1 = arith.extui %0 : i1 to i32
    %c0_i32_0 = arith.constant 0 : i32
    %2 = arith.cmpi ne, %1, %c0_i32_0 : i32
    scf.if %2 {
      %cst_10 = arith.constant 0.000000e+00 : f32
      %12 = vector.broadcast %cst_10 : f32 to vector<16x96xf32>
      %c0_11 = arith.constant 0 : index
      %c0_12 = arith.constant 0 : index
      %13 = vector.load %arg7[%c0_11, %c0_12] : memref<16x96xf32, #tpu.memory_space<vmem>>, vector<16x96xf32>
      tpu.vector_store %arg7[%c0_11, %c0_12], %12 {strides = array<i32>} : memref<16x96xf32, #tpu.memory_space<vmem>>, vector<16x96xf32>,
    } else {
    }
    %c0 = arith.constant 0 : index
    %c0_1 = arith.constant 0 : index
    %3 = vector.load %arg7[%c0, %c0_1] : memref<16x96xf32, #tpu.memory_space<vmem>>, vector<16x96xf32>
    %c0_2 = arith.constant 0 : index
    %c0_3 = arith.constant 0 : index
    %4 = vector.load %arg3[%c0_2, %c0_3] : memref<16x32xf32, #tpu.memory_space<vmem>>, vector<16x32xf32>
    %c0_4 = arith.constant 0 : index
    %c0_5 = arith.constant 0 : index
    %5 = vector.load %arg4[%c0_4, %c0_5] : memref<32x96xf32, #tpu.memory_space<vmem>>, vector<32x96xf32>
    %cst = arith.constant dense<0.000000e+00> : vector<16x96xf32>
    %6 = tpu.matmul %4, %5, %cst {dimension_numbers = #tpu.dot_dimension_numbers<[1], [0], [0], [1], [0, 0, 1, 1], [], []>} : vector<16x32xf32>, vector<32x96xf32>, vector<16x96xf32> -> vector<16x96xf32>
    %7 = arith.addf %3, %6 : vector<16x96xf32>
    %c0_6 = arith.constant 0 : index
    %c0_7 = arith.constant 0 : index
    %8 = vector.load %arg7[%c0_6, %c0_7] : memref<16x96xf32, #tpu.memory_space<vmem>>, vector<16x96xf32>
    tpu.vector_store %arg7[%c0_6, %c0_7], %7 {strides = array<i32>} : memref<16x96xf32, #tpu.memory_space<vmem>>, vector<16x96xf32>,
    %c0_i32_8 = arith.constant 0 : i32
    %9 = arith.cmpi eq, %arg2, %c0_i32_8 : i32
    %10 = arith.extui %9 : i1 to i32
    %c0_i32_9 = arith.constant 0 : i32
    %11 = arith.cmpi ne, %10, %c0_i32_9 : i32
    scf.if %11 {
      %c0_10 = arith.constant 0 : index
      %c0_11 = arith.constant 0 : index
      %12 = vector.load %arg7[%c0_10, %c0_11] : memref<16x96xf32, #tpu.memory_space<vmem>>, vector<16x96xf32>
      %c0_12 = arith.constant 0 : index
      %c0_13 = arith.constant 0 : index
      %13 = vector.load %arg5[%c0_12, %c0_13] : memref<1x96xf32, #tpu.memory_space<vmem>>, vector<1x96xf32>
      %14 = vector.broadcast %13 : vector<1x96xf32> to vector<16x96xf32>
      %15 = arith.addf %12, %14 : vector<16x96xf32>
      %c0_14 = arith.constant 0 : index
      %c0_15 = arith.constant 0 : index
      %16 = vector.load %arg6[%c0_14, %c0_15] : memref<16x96xf32, #tpu.memory_space<vmem>>, vector<16x96xf32>
      tpu.vector_store %arg6[%c0_14, %c0_15], %15 {strides = array<i32>} : memref<16x96xf32, #tpu.memory_space<vmem>>, vector<16x96xf32>,
    } else {
    }
    return
  }
  func.func @transform_0(%arg0: i32, %arg1: i32, %arg2: i32) -> (i32, i32) {
    %c0_i32 = arith.constant 0 : i32
    return %arg0, %arg2 : i32, i32
  }
  func.func @transform_1(%arg0: i32, %arg1: i32, %arg2: i32) -> (i32, i32) {
    %c0_i32 = arith.constant 0 : i32
    return %arg2, %arg1 : i32, i32
  }
  func.func @transform_2(%arg0: i32, %arg1: i32, %arg2: i32) -> (i32, i32) {
    %c0_i32 = arith.constant 0 : i32
    %c0_i32_0 = arith.constant 0 : i32
    return %c0_i32, %arg1 : i32, i32
  }
  func.func @transform_3(%arg0: i32, %arg1: i32, %arg2: i32) -> (i32, i32) {
    %c0_i32 = arith.constant 0 : i32
    return %arg0, %arg1 : i32, i32
  }
}

</mosaic_0001>

<bundles_post_ra>
// kernel: tpu_custom_call.1
= control target key start
LH: loop header
LB: loop body
LE: loop exit
PB: predicated region body
PF: predicated region fallthrough
CT: control target
= control target key end

     0   :  { %8 = vsyncpa [#allocation4], 0  ;;  %s274_s0 = inlined_call_operand.hbm [shape: f32[16,32], index: 0, kind: input, shape index: {}]   ;;  %s275_s1 = inlined_call_operand.hbm [shape: f32[32,96], index: 1, kind: input, shape index: {}]   ;;  %s276_s2 = inlined_call_operand.vmem [shape: f32[1,96], index: 2, kind: input, shape index: {}]   ;;  %s277_s3 = inlined_call_operand.hbm [shape: f32[16,96], index: 3, kind: output, shape index: {}]  }
   0x1   :  { %9 = vsyncpa [#allocation7], 0 }
   0x2   :  { %10 = vsyncpa [#allocation5], 0  ;;  %s15_s14 = sshll.u32 %s274_s0, 4  ;;  %s221_s15 = smov [#allocation3]   ;;  %s16_s14 = int_to_ptr.hbm [resolvable:$true] %s15_s14 }
   0x3   :  { %s17_s16 = sshll.u32 %s221_s15, 4  ;;  %s28_s19 = sshll.u32 %s275_s1, 4  ;;  %s18_s16 = int_to_ptr.vmem [resolvable:$true] %s17_s16  ;;  %s29_s19 = int_to_ptr.hbm [resolvable:$true] %s28_s19 }
   0x4   :  { %s222_s20 = smov 128   ;;  %s223_s21 = smov 8  }
   0x5   :  { %23 = dma.hbm_to_vmem [thread:$0]  %s16_s14, 256, %s18_s16, [#allocation4], %s222_s20, %s222_s20, %s223_s21  }
   0x6   :  { %s224_s22 = smov [#allocation6]  }
   0x7   :  { %s30_s23 = sshll.u32 %s224_s22, 4  ;;  %s31_s23 = int_to_ptr.vmem [resolvable:$true] %s30_s23 }
   0x8   :  { %36 = dma.hbm_to_vmem [thread:$0]  %s29_s19, 512, %s31_s23, [#allocation7], %s222_s20, %s222_s20, %s223_s21  }
   0x9   :  { %215 = dma.done.wait [#allocation4], 256  }
   0xa   :  { %216 = vsyncadd [#allocation4], 4294967040 }
   0xb   :  { %217 = dma.done.wait [#allocation7], 512  }
   0xc   :  { %218 = vsyncadd [#allocation7], 4294966784  ;;  %vm51_vm0 = vcmask 785408   ;;  %v225_v0 = vmov 0.0   ;;  %v61_v1 = vld [vmem:[#allocation6 + $0x18] sm:$0xff]  ;;  %v60_v2 = vld [vmem:[#allocation6 + $0x10] sm:$0xff] }
   0xd   :  { %52 = vst.msk [vmem:[#allocation2] sm:$0xff] %vm51_vm0, %v225_v0  ;;  %81 = vmatpush.msra.mxu0 %v61_v1  ;;  %132 = vmatpush.msra.mxu1 %v61_v1  ;;  %v59_v3 = vld [vmem:[#allocation6 + $0x8] sm:$0xff]  ;;  %v58_v4 = vld [vmem:[#allocation6] sm:$0xff]  ;;  %v56_v5 = vld [vmem:[#allocation3] sm:$0xff]  ;;  %vm62_vm1 = vcmask 261120   ;;  %s226_s24 = smov [#allocation8]  }
   0xe   :  { %53 = vst.msk [vmem:[#allocation2 + $0x8] sm:$0xff] %vm51_vm0, %v225_v0  ;;  %v57_v6 = vld [vmem:[#allocation3 + $0x8] sm:$0xff]  ;;  %v142_v13 = vld [vmem:[%s276_s2] ss:$0 sm:$0xff]  ;;  %s114_s25 = sshll.u32 %s226_s24, 4  ;;  %s116_s28 = sshll.u32 %s277_s3, 4  ;;  %s115_s25 = int_to_ptr.vmem [resolvable:$true] %s114_s25  ;;  %s117_s28 = int_to_ptr.hbm [resolvable:$true] %s116_s28 }
   0xf   :  { %82 = vmatpush.msra.mxu0 %v60_v2  ;;  %133 = vmatpush.msra.mxu1 %v60_v2 }
  0x11   :  { %83 = vmatpush.msra.mxu0 %v59_v3  ;;  %134 = vmatpush.msra.mxu1 %v59_v3 }
  0x13   :  { %84 = vmatpush.msra.mxu0 %v58_v4  ;;  %135 = vmatpush.msra.mxu1 %v58_v4 }
  0x14   :  { %130 = vmatmul.msk.f32.vlgmr.msra.gmra.mxu0 %vm62_vm1, %v56_v5  ;;  %131 = vmatmul.msk.f32.vlgmr.msra.gmra.mxu1 %vm62_vm1, %v57_v6  ;;  %v54_v7 = vld [vmem:[#allocation2] sm:$0xff] }
  0x15   :  { %v55_v8 = vld [vmem:[#allocation2 + $0x8] sm:$0xff] }
  0x91   :  { %v86_v9 = vpop.f32.mrf.mxu0  ;;  %v89_v10 = vpop.f32.mrf.mxu1 }
  0x92   :  { %v92_v11 = vadd.f32 %v86_v9, %v54_v7  ;;  %v93_v12 = vadd.f32 %v89_v10, %v55_v8 }
  0x94   :  { %95 = vst.msk [vmem:[#allocation2] sm:$0xff] %vm51_vm0, %v92_v11 }
  0x95   :  { %96 = vst.msk [vmem:[#allocation2 + $0x8] sm:$0xff] %vm51_vm0, %v93_v12 }
  0x9b   :  { %v100_v14 = vld [vmem:[#allocation2] sm:$0xff] }
  0x9c   :  { %v101_v15 = vld [vmem:[#allocation2 + $0x8] sm:$0xff]  ;;  %v106_v16 = vadd.f32 %v142_v13, %v100_v14 }
  0x9d   :  { %v107_v17 = vadd.f32 %v142_v13, %v101_v15 }
  0x9e   :  { %108 = vst.msk [vmem:[#allocation8] sm:$0xff] %vm51_vm0, %v106_v16 }
  0x9f   :  { %109 = vst.msk [vmem:[#allocation8 + $0x8] sm:$0xff] %vm51_vm0, %v107_v17 }
  0xa0   :  { %122 = dma.vmem_to_hbm [thread:$0]  %s115_s25, 256, %s117_s28, [#allocation5], %s222_s20, %s222_s20, %s223_s21  }
  0xa1   :  { %219 = dma.done.wait [#allocation5], 256  }
  0xa2   :  { %220 = vsyncadd [#allocation5], 4294967040 }
  0xa3   :  { %127 = vsyncpa [#allocation4], 1 }
  0xa4   :  { %128 = vsyncpa [#allocation7], 1 }
  0xa5   :  { %129 = vsyncpa [#allocation5], 1 }

</bundles_post_ra>
